<compile_context>
chip_gen: v6e
topology: v6e:2x2x1
jax: 0.10.0
libtpu: 0.0.40
codegen_flags: <defaults>
</compile_context>

<pallas_src>
import jax
import jax.numpy as jnp
from jax.experimental import pallas as pl
from jax.experimental.pallas import tpu as pltpu

_HID = 64            # logical hidden width (nn.Linear(..., 64))
_HID_P = 128         # lane-dense padded hidden width
_SMALL_B = 128       # single-grid-step fast path threshold
_VMEM_BUDGET = 12 * 1024 * 1024   # conservative per-kernel working-set budget


def _round_up(n, m):
    return ((n + m - 1) // m) * m


def _policy_mlp_kernel(x_ref, w1_ref, b1_ref, w2_ref, b2_ref, w3r_ref, b3_ref, o_ref):
    # x tile: (tb, F) f32 ; weights f32 [in, out] ; biases f32 (1, 128) ; b3 scalar in SMEM.
    x = x_ref[...]

    h1 = jnp.maximum(
        jnp.dot(x, w1_ref[...], preferred_element_type=jnp.float32) + b1_ref[...], 0.0)
    h2 = jnp.maximum(
        jnp.dot(h1, w2_ref[...], preferred_element_type=jnp.float32) + b2_ref[...], 0.0)

    # Pack the single real output channel lane-dense:
    #   (1, 128) @ (128, tb) -> (1, tb), row 0 holds the real logits.
    # The (tb,128)->(128,tb) transpose runs on the otherwise-idle XLU.
    logits = jnp.dot(w3r_ref[...], h2.T, preferred_element_type=jnp.float32) + b3_ref[0]

    # Sigmoid (+bias) only on the packed real outputs: 1 EUP op per batch row.
    o_ref[...] = jax.nn.sigmoid(logits)


def init_params(key, feature_size):
    """Deterministic init mimicking nn.Linear's U(-1/sqrt(in), 1/sqrt(in)).
    Weights stored as [in_features, out_features] (transposed vs. PyTorch)."""
    def linear_init(k, fan_in, fan_out):
        kw, kb = jax.random.split(k)
        bound = 1.0 / jnp.sqrt(fan_in)
        w = jax.random.uniform(kw, (fan_in, fan_out), jnp.float32, -bound, bound)
        b = jax.random.uniform(kb, (1, fan_out), jnp.float32, -bound, bound)
        return w, b

    k1, k2, k3 = jax.random.split(key, 3)
    w1, b1 = linear_init(k1, feature_size, _HID)
    w2, b2 = linear_init(k2, _HID, _HID)
    w3, b3 = linear_init(k3, _HID, 1)
    return (w1, b1, w2, b2, w3, b3)


def prepare_params(params):
    """Zero-pad hidden dims 64 -> 128 (lane-dense).  Zero columns + zero biases
    keep padded channels exactly 0 through ReLU, so padding is a mathematical
    no-op for the real output.  The head weight becomes a (1, 128) row vector
    and its bias a scalar (SMEM)."""
    w1, b1, w2, b2, w3, b3 = params
    F = w1.shape[0]

    w1p = jnp.zeros((F, _HID_P), jnp.float32).at[:, :_HID].set(w1)
    b1p = jnp.zeros((1, _HID_P), jnp.float32).at[:, :_HID].set(b1.reshape(1, -1))
    w2p = jnp.zeros((_HID_P, _HID_P), jnp.float32).at[:_HID, :_HID].set(w2)
    b2p = jnp.zeros((1, _HID_P), jnp.float32).at[:, :_HID].set(b2.reshape(1, -1))
    w3r = jnp.zeros((1, _HID_P), jnp.float32).at[0, :_HID].set(w3.reshape(-1))
    b3s = b3.reshape(-1).astype(jnp.float32)       # shape (1,) scalar for SMEM

    return (w1p, b1p, w2p, b2p, w3r, b3s)


def _choose_batch_tile(B, F, max_block_b=4096):
    """F-aware, VMEM-budgeted batch tile.

    Small B: single grid step, rounded to the f32 sublane quantum (8).
    Large B: multiple of 128 (lane-dense (1, tb) output block), capped by the
    VMEM budget and sized so there are >= 2 grid steps (v7x has 2 TensorCores).
    """
    if B <= _SMALL_B:
        return _round_up(max(B, 1), 8)

    # All-f32 working set per batch row: double-buffered x + h1 + h2 + h2^T
    # + double-buffered output element.
    per_row = (2 * F + 3 * _HID_P + 2) * 4
    fixed = (F * _HID_P + _HID_P * _HID_P + 3 * _HID_P) * 4   # resident weights/biases
    cap_rows = max((_VMEM_BUDGET - fixed) // per_row, 128)

    tb = min(max_block_b, cap_rows, _round_up(pl.cdiv(B, 2), 128))
    return max((tb // 128) * 128, 128)


def policy_model_forward(x, padded_params, *, max_block_b=4096):
    """x: [B, feature_size] f32 -> [B, 1] f32 (sigmoid probabilities)."""
    w1, b1, w2, b2, w3r, b3 = padded_params
    B, F = x.shape

    tb = _choose_batch_tile(B, F, max_block_b)
    num_tiles = pl.cdiv(B, tb)
    b_pad = num_tiles * tb

    # No dtype cast pass: f32 x goes straight in.  Pad only when B is not
    # tile-aligned (zero rows -> harmless, sliced off below).
    xin = x if b_pad == B else jnp.pad(x, ((0, b_pad - B), (0, 0)))

    out_row = pl.pallas_call(
        _policy_mlp_kernel,
        out_shape=jax.ShapeDtypeStruct((1, b_pad), jnp.float32),
        grid_spec=pl.GridSpec(
            grid=(num_tiles,),
            in_specs=[
                pl.BlockSpec((tb, F), lambda i: (i, 0)),            # x: streamed per tile
                pl.BlockSpec((F, _HID_P), lambda i: (0, 0)),        # weights/biases:
                pl.BlockSpec((1, _HID_P), lambda i: (0, 0)),        #   constant index ->
                pl.BlockSpec((_HID_P, _HID_P), lambda i: (0, 0)),   #   VMEM-resident
                pl.BlockSpec((1, _HID_P), lambda i: (0, 0)),
                pl.BlockSpec((1, _HID_P), lambda i: (0, 0)),        # w3 as (1,128) row
                pl.BlockSpec(memory_space=pltpu.MemorySpace.SMEM),  # b3 scalar
            ],
            out_specs=pl.BlockSpec((1, tb), lambda i: (0, i)),      # lane-dense logits row
        ),
        compiler_params=pltpu.CompilerParams(
            dimension_semantics=("parallel",),      # megacore sharding on v7x
            vmem_limit_bytes=32 * 1024 * 1024,      # explicit headroom (v5e default is 16 MiB)
        ),
    )(xin, w1, b1, w2, b2, w3r, b3)

    # Real outputs are the first B lanes of row 0; reshape to the (B, 1) API shape.
    return out_row[0, :B].reshape(B, 1)


def _reference_forward_f32(x, params):
    """Full-f32 reference of the original PyTorch semantics."""
    w1, b1, w2, b2, w3, b3 = params
    h1 = jax.nn.relu(x @ w1 + b1)
    h2 = jax.nn.relu(h1 @ w2 + b2)
    return jax.nn.sigmoid(h2 @ w3 + b3)


if __name__ == "__main__":
    feature_size = 32

    key = jax.random.PRNGKey(0)
    k_params, k_x_small, k_x_large = jax.random.split(key, 3)

    params = init_params(k_params, feature_size)
    padded_params = prepare_params(params)

    # Small-batch fast path (single grid step), matching the module's typical use.
    batch = 2
    x_small = jax.random.normal(k_x_small, (batch, feature_size), jnp.float32)
    out_small = jax.block_until_ready(policy_model_forward(x_small, padded_params))
    ref_small = _reference_forward_f32(x_small, params)
    assert out_small.shape == (batch, 1)
    assert jnp.allclose(out_small, ref_small, atol=5e-3, rtol=5e-3), \
        "Pallas output mismatch vs f32 reference (small batch)"

    # Multi-tile path (exercises tiled grid, lane-dense output packing).
    batch_l = 512
    x_large = jax.random.normal(k_x_large, (batch_l, feature_size), jnp.float32)
    out_large = jax.block_until_ready(policy_model_forward(x_large, padded_params))
    ref_large = _reference_forward_f32(x_large, params)
    assert out_large.shape == (batch_l, 1)
    assert jnp.allclose(out_large, ref_large, atol=5e-3, rtol=5e-3), \
        "Pallas output mismatch vs f32 reference (large batch)"

    print("KERNEL_OK")
</pallas_src>

<mosaic_0001>
module attributes {stable_mosaic.version = 11 : i64} {
  func.func @_policy_mlp_kernel(%arg0: i32, %arg1: memref<8x32xf32, #tpu.memory_space<vmem>>, %arg2: memref<32x128xf32, #tpu.memory_space<vmem>>, %arg3: memref<1x128xf32, #tpu.memory_space<vmem>>, %arg4: memref<128x128xf32, #tpu.memory_space<vmem>>, %arg5: memref<1x128xf32, #tpu.memory_space<vmem>>, %arg6: memref<1x128xf32, #tpu.memory_space<vmem>>, %arg7: memref<1xf32, #tpu.memory_space<smem>>, %arg8: memref<1x8xf32, #tpu.memory_space<vmem>>) attributes {dimension_semantics = [#tpu.dimension_semantics<parallel>], iteration_bounds = array<i64: 1>, scalar_prefetch = 0 : i64, scratch_operands = 0 : i64, tpu.core_type = #tpu.core_type<tc>, window_params = [{transform_indices = @transform_0, window_bounds = array<i64: 8, 32>}, {pipeline_mode = #tpu.pipeline_mode<synchronous>, transform_indices = @transform_1, window_bounds = array<i64: 32, 128>}, {pipeline_mode = #tpu.pipeline_mode<synchronous>, transform_indices = @transform_2, window_bounds = array<i64: 1, 128>}, {pipeline_mode = #tpu.pipeline_mode<synchronous>, transform_indices = @transform_3, window_bounds = array<i64: 128, 128>}, {pipeline_mode = #tpu.pipeline_mode<synchronous>, transform_indices = @transform_4, window_bounds = array<i64: 1, 128>}, {pipeline_mode = #tpu.pipeline_mode<synchronous>, transform_indices = @transform_5, window_bounds = array<i64: 1, 128>}, {transform_indices = @transform_6, window_bounds = array<i64: 1>}, {transform_indices = @transform_7, window_bounds = array<i64: 1, 8>}]} {
    %c0 = arith.constant 0 : index
    %c0_0 = arith.constant 0 : index
    %0 = vector.load %arg1[%c0, %c0_0] : memref<8x32xf32, #tpu.memory_space<vmem>>, vector<8x32xf32>
    %c0_1 = arith.constant 0 : index
    %c0_2 = arith.constant 0 : index
    %1 = vector.load %arg2[%c0_1, %c0_2] : memref<32x128xf32, #tpu.memory_space<vmem>>, vector<32x128xf32>
    %cst = arith.constant dense<0.000000e+00> : vector<8x128xf32>
    %2 = tpu.matmul %0, %1, %cst {dimension_numbers = #tpu.dot_dimension_numbers<[1], [0], [0], [1], [0, 0, 1, 1], [], []>} : vector<8x32xf32>, vector<32x128xf32>, vector<8x128xf32> -> vector<8x128xf32>
    %c0_3 = arith.constant 0 : index
    %c0_4 = arith.constant 0 : index
    %3 = vector.load %arg3[%c0_3, %c0_4] : memref<1x128xf32, #tpu.memory_space<vmem>>, vector<1x128xf32>
    %4 = vector.broadcast %3 : vector<1x128xf32> to vector<8x128xf32>
    %5 = arith.addf %2, %4 : vector<8x128xf32>
    %cst_5 = arith.constant 0.000000e+00 : f32
    %6 = vector.broadcast %cst_5 : f32 to vector<8x128xf32>
    %7 = arith.maximumf %5, %6 : vector<8x128xf32>
    %c0_6 = arith.constant 0 : index
    %c0_7 = arith.constant 0 : index
    %8 = vector.load %arg4[%c0_6, %c0_7] : memref<128x128xf32, #tpu.memory_space<vmem>>, vector<128x128xf32>
    %cst_8 = arith.constant dense<0.000000e+00> : vector<8x128xf32>
    %9 = tpu.matmul %7, %8, %cst_8 {dimension_numbers = #tpu.dot_dimension_numbers<[1], [0], [0], [1], [0, 0, 1, 1], [], []>} : vector<8x128xf32>, vector<128x128xf32>, vector<8x128xf32> -> vector<8x128xf32>
    %c0_9 = arith.constant 0 : index
    %c0_10 = arith.constant 0 : index
    %10 = vector.load %arg5[%c0_9, %c0_10] : memref<1x128xf32, #tpu.memory_space<vmem>>, vector<1x128xf32>
    %11 = vector.broadcast %10 : vector<1x128xf32> to vector<8x128xf32>
    %12 = arith.addf %9, %11 : vector<8x128xf32>
    %cst_11 = arith.constant 0.000000e+00 : f32
    %13 = vector.broadcast %cst_11 : f32 to vector<8x128xf32>
    %14 = arith.maximumf %12, %13 : vector<8x128xf32>
    %c0_12 = arith.constant 0 : index
    %c0_13 = arith.constant 0 : index
    %15 = vector.load %arg6[%c0_12, %c0_13] : memref<1x128xf32, #tpu.memory_space<vmem>>, vector<1x128xf32>
    %16 = tpu.transpose %14, [1, 0] : vector<8x128xf32> -> vector<128x8xf32>
    %cst_14 = arith.constant dense<0.000000e+00> : vector<1x8xf32>
    %17 = tpu.matmul %15, %16, %cst_14 {dimension_numbers = #tpu.dot_dimension_numbers<[1], [0], [0], [1], [0, 0, 1, 1], [], []>} : vector<1x128xf32>, vector<128x8xf32>, vector<1x8xf32> -> vector<1x8xf32>
    %c0_15 = arith.constant 0 : index
    %18 = memref.load %arg7[%c0_15] : memref<1xf32, #tpu.memory_space<smem>>
    %19 = vector.broadcast %18 : f32 to vector<1x8xf32>
    %20 = arith.addf %17, %19 : vector<1x8xf32>
    %21 = arith.negf %20 : vector<1x8xf32>
    %22 = math.exp %21 : vector<1x8xf32>
    %cst_16 = arith.constant 1.000000e+00 : f32
    %23 = vector.broadcast %cst_16 : f32 to vector<1x8xf32>
    %24 = arith.addf %23, %22 : vector<1x8xf32>
    %25 = arith.divf %23, %24 : vector<1x8xf32>
    %c0_17 = arith.constant 0 : index
    %c0_18 = arith.constant 0 : index
    %26 = vector.load %arg8[%c0_17, %c0_18] : memref<1x8xf32, #tpu.memory_space<vmem>>, vector<1x8xf32>
    tpu.vector_store %arg8[%c0_17, %c0_18], %25 {strides = array<i32>} : memref<1x8xf32, #tpu.memory_space<vmem>>, vector<1x8xf32>,
    return
  }
  func.func @transform_0(%arg0: i32) -> (i32, i32) {
    %c0_i32 = arith.constant 0 : i32
    %c0_i32_0 = arith.constant 0 : i32
    return %arg0, %c0_i32 : i32, i32
  }
  func.func @transform_1(%arg0: i32) -> (i32, i32) {
    %c0_i32 = arith.constant 0 : i32
    %c0_i32_0 = arith.constant 0 : i32
    %c0_i32_1 = arith.constant 0 : i32
    return %c0_i32, %c0_i32_0 : i32, i32
  }
  func.func @transform_2(%arg0: i32) -> (i32, i32) {
    %c0_i32 = arith.constant 0 : i32
    %c0_i32_0 = arith.constant 0 : i32
    %c0_i32_1 = arith.constant 0 : i32
    return %c0_i32, %c0_i32_0 : i32, i32
  }
  func.func @transform_3(%arg0: i32) -> (i32, i32) {
    %c0_i32 = arith.constant 0 : i32
    %c0_i32_0 = arith.constant 0 : i32
    %c0_i32_1 = arith.constant 0 : i32
    return %c0_i32, %c0_i32_0 : i32, i32
  }
  func.func @transform_4(%arg0: i32) -> (i32, i32) {
    %c0_i32 = arith.constant 0 : i32
    %c0_i32_0 = arith.constant 0 : i32
    %c0_i32_1 = arith.constant 0 : i32
    return %c0_i32, %c0_i32_0 : i32, i32
  }
  func.func @transform_5(%arg0: i32) -> (i32, i32) {
    %c0_i32 = arith.constant 0 : i32
    %c0_i32_0 = arith.constant 0 : i32
    %c0_i32_1 = arith.constant 0 : i32
    return %c0_i32, %c0_i32_0 : i32, i32
  }
  func.func @transform_6(%arg0: i32) -> i32 {
    %c0_i32 = arith.constant 0 : i32
    %c0_i32_0 = arith.constant 0 : i32
    return %c0_i32 : i32
  }
  func.func @transform_7(%arg0: i32) -> (i32, i32) {
    %c0_i32 = arith.constant 0 : i32
    %c0_i32_0 = arith.constant 0 : i32
    return %c0_i32, %arg0 : i32, i32
  }
}

</mosaic_0001>

<bundles_post_ra>
// kernel: tpu_custom_call.1
= control target key start
LH: loop header
LB: loop body
LE: loop exit
PB: predicated region body
PF: predicated region fallthrough
CT: control target
= control target key end

     0   :  { %13 = vsyncpa [#allocation4], 0  ;;  %s621_s0 = inlined_call_operand.hbm [shape: f32[8,32], index: 0, kind: input, shape index: {}]   ;;  %s622_s1 = inlined_call_operand.hbm [shape: f32[32,128], index: 1, kind: input, shape index: {}]   ;;  %s623_s2 = inlined_call_operand.vmem [shape: f32[1,128], index: 2, kind: input, shape index: {}]   ;;  %s624_s3 = inlined_call_operand.hbm [shape: f32[128,128], index: 3, kind: input, shape index: {}]   ;;  %s625_s4 = inlined_call_operand.vmem [shape: f32[1,128], index: 4, kind: input, shape index: {}]   ;;  %s626_s5 = inlined_call_operand.vmem [shape: f32[1,128], index: 5, kind: input, shape index: {}]   ;;  %s627_s6 = inlined_call_operand.<no memory space> [shape: f32[1], index: 6, kind: input, shape index: {}]   ;;  %s628_s7 = inlined_call_operand.hbm [shape: f32[1,8], index: 7, kind: output, shape index: {}]  }
   0x1   :  { %14 = vsyncpa [#allocation7], 0 }
   0x2   :  { %15 = vsyncpa [#allocation5], 0  ;;  %s522_s24 = smov [#allocation6]  }
   0x3   :  { %s31_s25 = sshll.u32 %s522_s24, 4  ;;  %s32_s25 = int_to_ptr.vmem [resolvable:$true] %s31_s25 }
   0x4   :  { %s444_s26 = scalar_lea.vmem %s32_s25, 512  ;;  %p449_p1 = scmp.lt.s32.totalorder %s32_s25, %s32_s25 }
   0x5   :  { %p445_p0 = scmp.ne.s32.totalorder %s32_s25, %s444_s26  ;;  %p450_p2 = scmp.lt.s32.totalorder %s444_s26, %s444_s26 }
   0x7   :  { %p451_p3 = por %p450_p2, %p449_p1 }
   0x9   :  { %p452_p4 = pnand %p451_p3, %p445_p0 }
   0xb   :  { %455 = shalt.err (!%p452_p4)
}
   0xc   :  { %s523_s27 = smov 128   ;;  %s524_s28 = smov 8  }
   0xd   :  { %37 = dma.hbm_to_vmem [thread:$0]  %s622_s1, 512, %s32_s25, [#allocation7], %s523_s27, %s523_s27, %s524_s28  }
   0xe   :  { %s525_s8 = smov [#allocation3]   ;;  %s526_s10 = smov [#allocation8]  }
   0xf   :  { %s22_s9 = sshll.u32 %s525_s8, 4  ;;  %s45_s11 = sshll.u32 %s526_s10, 4  ;;  %s23_s9 = int_to_ptr.vmem [resolvable:$true] %s22_s9  ;;  %s46_s11 = int_to_ptr.vmem [resolvable:$true] %s45_s11 }
  0x10   :  { %s464_s12 = scalar_lea.vmem %s23_s9, 128  ;;  %p469_p6 = scmp.lt.s32.totalorder %s23_s9, %s23_s9 }
  0x11   :  { %p465_p5 = scmp.ne.s32.totalorder %s23_s9, %s464_s12  ;;  %p470_p7 = scmp.lt.s32.totalorder %s464_s12, %s464_s12 }
  0x13   :  { %p471_p8 = por %p470_p7, %p469_p6 }
  0x15   :  { %p472_p9 = pnand %p471_p8, %p465_p5 }
  0x17   :  { %475 = shalt.err (!%p472_p9)
}
  0x18   :  { %25 = dma.hbm_to_vmem [thread:$0]  %s621_s0, 128, %s23_s9, [#allocation4]  }
  0x19   :  { %s484_s15 = scalar_lea.vmem %s46_s11, 2048  ;;  %p489_p11 = scmp.lt.s32.totalorder %s46_s11, %s46_s11 }
  0x1a   :  { %p485_p10 = scmp.ne.s32.totalorder %s46_s11, %s484_s15  ;;  %p490_p12 = scmp.lt.s32.totalorder %s484_s15, %s484_s15 }
  0x1c   :  { %p491_p13 = por %p490_p12, %p489_p11 }
  0x1e   :  { %p492_p0 = pnand %p491_p13, %p485_p10 }
  0x20   :  { %495 = shalt.err (!%p492_p0)
}
  0x21   :  { %51 = dma.hbm_to_vmem [thread:$0]  %s624_s3, 2048, %s46_s11, [#allocation7], %s523_s27, %s523_s27, %s524_s28  }
  0x22   :  { %516 = dma.done.wait [#allocation4], 128  }
  0x23   :  { %517 = vsyncadd [#allocation4], 4294967168 }
  0x24   :  { %518 = dma.done.wait [#allocation7], 2560  }
  0x25   :  { %519 = vsyncadd [#allocation7], 4294964736  ;;  %v527_v0 = vmov 0.0   ;;  %vm528_vm0 = vmmov 0   ;;  %v71_v1 = vld [vmem:[#allocation6 + $0x18] sm:$0xff]  ;;  %v70_v2 = vld [vmem:[#allocation6 + $0x10] sm:$0xff]  ;;  %v250_v33 = vstv %s627_s6 }
  0x26   :  { %373 = vmatprep.subr.mxu0 %v527_v0  ;;  %381 = vmatprep.mubr.msk.f32.mxu0 %vm528_vm0, %v527_v0  ;;  %v169_v3 = vld [vmem:[#allocation8 + $0x78] sm:$0xff]  ;;  %v69_v4 = vld [vmem:[#allocation6 + $0x8] sm:$0xff]  ;;  %v168_v5 = vld [vmem:[#allocation8 + $0x70] sm:$0xff]  ;;  %vm79_vm1 = vcmask 261120   ;;  %vm327_vm2 = vcmask 57344  }
  0x27   :  { %384 = vmatprep.subr.mxu1 %v527_v0  ;;  %416 = vmatprep.mubr.msk.f32.mxu1 %vm528_vm0, %v527_v0  ;;  %v167_v6 = vld [vmem:[#allocation8 + $0x68] sm:$0xff]  ;;  %v68_v7 = vld [vmem:[#allocation6] sm:$0xff]  ;;  %v67_v8 = vld [vmem:[#allocation3] sm:$0xff] }
  0x28   :  { %374 = vmatpush3.msra.mxu0 %v71_v1  ;;  %385 = vmatpush3.msra.mxu1 %v169_v3  ;;  %v166_v9 = vld [vmem:[#allocation8 + $0x60] sm:$0xff]  ;;  %v165_v10 = vld [vmem:[#allocation8 + $0x58] sm:$0xff]  ;;  %v164_v11 = vld [vmem:[#allocation8 + $0x50] sm:$0xff] }
  0x29   :  { %375 = vmatprep.subr.mxu0 %v527_v0  ;;  %386 = vmatprep.subr.mxu1 %v527_v0  ;;  %v163_v12 = vld [vmem:[#allocation8 + $0x48] sm:$0xff]  ;;  %v162_v13 = vld [vmem:[#allocation8 + $0x40] sm:$0xff]  ;;  %v161_v14 = vld [vmem:[#allocation8 + $0x38] sm:$0xff] }
  0x2a   :  { %376 = vmatpush3.msra.mxu0 %v70_v2  ;;  %387 = vmatpush3.msra.mxu1 %v168_v5  ;;  %v160_v15 = vld [vmem:[#allocation8 + $0x30] sm:$0xff]  ;;  %v159_v16 = vld [vmem:[#allocation8 + $0x28] sm:$0xff]  ;;  %v158_v17 = vld [vmem:[#allocation8 + $0x20] sm:$0xff] }
  0x2b   :  { %377 = vmatprep.subr.mxu0 %v527_v0  ;;  %388 = vmatprep.subr.mxu1 %v527_v0  ;;  %v157_v18 = vld [vmem:[#allocation8 + $0x18] sm:$0xff]  ;;  %v156_v19 = vld [vmem:[#allocation8 + $0x10] sm:$0xff]  ;;  %v155_v20 = vld [vmem:[#allocation8 + $0x8] sm:$0xff] }
  0x2c   :  { %378 = vmatpush3.msra.mxu0 %v69_v4  ;;  %389 = vmatpush3.msra.mxu1 %v167_v6  ;;  %v154_v21 = vld [vmem:[#allocation8] sm:$0xff]  ;;  %v345_v22 = vld [vmem:[%s623_s2] ss:$0 sm:$0xff] }
  0x2d   :  { %379 = vmatprep.subr.mxu0 %v527_v0  ;;  %390 = vmatprep.subr.mxu1 %v527_v0  ;;  %v347_v27 = vld [vmem:[%s625_s4] ss:$0 sm:$0xff]  ;;  %s529_s4 = smov [#allocation9]  }
  0x2e   :  { %380 = vmatpush3.msra.mxu0 %v68_v7  ;;  %391 = vmatpush3.msra.mxu1 %v166_v9  ;;  %v248_v32 = vld [vmem:[%s626_s5] sm:$0x1]  ;;  %s335_s22 = sshll.u32 %s529_s4, 4  ;;  %s336_s22 = int_to_ptr.vmem [resolvable:$true] %s335_s22 }
  0x2f   :  { %382 = vmatmul.mubr.msk.f32.vlgmr.msra.gmra.mxu0 %vm79_vm1, %v67_v8  ;;  %392 = vmatprep.subr.mxu1 %v527_v0  ;;  %s496_s5 = scalar_lea.vmem %s336_s22, 16  ;;  %s500_s23 = scalar_lea.vmem %s336_s22, 32 }
  0x30   :  { %419 = vmatprep.subr.mxu0 %v527_v0  ;;  %393 = vmatpush3.msra.mxu1 %v165_v10  ;;  %p497_p1 = scmp.ne.s32.totalorder %s336_s22, %s496_s5  ;;  %p501_p2 = scmp.lt.s32.totalorder %s336_s22, %s336_s22 }
  0x31   :  { %421 = vmatprep.mubr.msk.f32.mxu0 %vm528_vm0, %v527_v0  ;;  %394 = vmatprep.subr.mxu1 %v527_v0  ;;  %p502_p3 = scmp.lt.s32.totalorder %s500_s23, %s496_s5 }
  0x32   :  { %395 = vmatpush3.msra.mxu1 %v164_v11 }
  0x33   :  { %396 = vmatprep.subr.mxu1 %v527_v0  ;;  %p503_p4 = por %p502_p3, %p501_p2 }
  0x34   :  { %397 = vmatpush3.msra.mxu1 %v163_v12 }
  0x35   :  { %398 = vmatprep.subr.mxu1 %v527_v0  ;;  %p504_p5 = pnand %p503_p4, %p497_p1 }
  0x36   :  { %399 = vmatpush3.msra.mxu1 %v162_v13 }
  0x37   :  { %400 = vmatprep.subr.mxu1 %v527_v0 }
  0x38   :  { %401 = vmatpush3.msra.mxu1 %v161_v14 }
  0x39   :  { %402 = vmatprep.subr.mxu1 %v527_v0 }
  0x3a   :  { %403 = vmatpush3.msra.mxu1 %v160_v15 }
  0x3b   :  { %404 = vmatprep.subr.mxu1 %v527_v0 }
  0x3c   :  { %405 = vmatpush3.msra.mxu1 %v159_v16 }
  0x3d   :  { %406 = vmatprep.subr.mxu1 %v527_v0 }
  0x3e   :  { %407 = vmatpush3.msra.mxu1 %v158_v17 }
  0x3f   :  { %408 = vmatprep.subr.mxu1 %v527_v0 }
  0x40   :  { %409 = vmatpush3.msra.mxu1 %v157_v18 }
  0x41   :  { %410 = vmatprep.subr.mxu1 %v527_v0 }
  0x42   :  { %411 = vmatpush3.msra.mxu1 %v156_v19 }
  0x43   :  { %412 = vmatprep.subr.mxu1 %v527_v0 }
  0x44   :  { %413 = vmatpush3.msra.mxu1 %v155_v20 }
  0x45   :  { %414 = vmatprep.subr.mxu1 %v527_v0 }
  0x46   :  { %415 = vmatpush3.msra.mxu1 %v154_v21 }
  0xef   :  { %v149_v23 = vpop.f32.mrf.mxu0 }
  0xf0   :  { %v150_v24 = vadd.f32 %v345_v22, %v149_v23 }
  0xf1   :  { %v383_v25 = vpop.f32.mrf.mxu0 }
  0xf2   :  { %v153_v26 = vmax.f32 %v150_v24, 0.0 }
  0xf4   :  { %417 = vmatmul.mubr.f32.vlgmr.msra.gmra.mxu1 %v153_v26 }
 0x1b4   :  { %v243_v28 = vpop.f32.mrf.mxu1 }
 0x1b5   :  { %v244_v29 = vadd.f32 %v347_v27, %v243_v28 }
 0x1b6   :  { %v418_v30 = vpop.f32.mrf.mxu1 }
 0x1b7   :  { %v247_v31 = vmax.f32 %v244_v29, 0.0 }
 0x1b9   :  { %420 = vmatpush3.xpose.msra.mxu0 %v247_v31 }
 0x1bc   :  { %422 = vmatmul.mubr.f32.vlgmr.msra.gmra.mxu0 %v248_v32 }
 0x27c   :  { %v317_v34 = vpop.f32.mrf.mxu0 }
 0x27d   :  { %v318_v35 = vadd.f32 %v317_v34, %v250_v33 }
 0x27e   :  { %v423_v36 = vpop.f32.mrf.mxu0 }
 0x27f   :  { %v348_v37 = vmul.f32 -1.442695, %v318_v35 }
 0x281   :  { %432 = vpow2.f32 %v348_v37 }
 0x28e   :  { %v433_v38 = vpop.eup %432 }
 0x28f   :  { %v324_v39 = vadd.f32 1.0, %v433_v38 }
 0x291   :  { %434 = vrcp.f32 %v324_v39 }
 0x29e   :  { %v435_v40 = vpop.eup %434 }
 0x29f   :  { %328 = vst.msk [vmem:[#allocation9] sm:$0x1] %vm327_vm2, %v435_v40 }
 0x2a0   :  { %507 = shalt.err (!%p504_p5)
}
 0x2a1   :  { %338 = dma.vmem_to_hbm [thread:$0]  %s336_s22, 16, %s628_s7, [#allocation5]  }
 0x2a2   :  { %520 = dma.done.wait [#allocation5], 16  }
 0x2a3   :  { %521 = vsyncadd [#allocation5], 4294967280 }
 0x2a4   :  { %342 = vsyncpa [#allocation4], 1 }
 0x2a5   :  { %343 = vsyncpa [#allocation7], 1 }
 0x2a6   :  { %344 = vsyncpa [#allocation5], 1 }

</bundles_post_ra>
